<compile_context>
chip_gen: v7x
topology: tpu7x:2x2x1
jax: 0.10.0
libtpu: 0.0.40
codegen_flags: <defaults>
</compile_context>

<pallas_src>
import functools

import jax
import jax.numpy as jnp
from jax.experimental import pallas as pl
from jax.experimental.pallas import tpu as pltpu


def rownet_kernel(x_ref, w1_ref, b1_ref, w2_ref, b2_ref, w3_ref, b3_ref, o_ref):
    # Weights arrive pre-transposed as (in_features, out_features): the MXU
    # consumes them in place, no in-kernel relayout.
    x = x_ref[...]

    # fc1 + leaky_relu(0.2)
    h = jnp.dot(x, w1_ref[...], preferred_element_type=jnp.float32) + b1_ref[...]
    h = jnp.maximum(h, 0.2 * h)

    # fc2 + leaky_relu(0.2)
    h = jnp.dot(h, w2_ref[...], preferred_element_type=jnp.float32) + b2_ref[...]
    h = jnp.maximum(h, 0.2 * h)

    # fc3 (no activation)
    out = jnp.dot(h, w3_ref[...], preferred_element_type=jnp.float32) + b3_ref[...]
    o_ref[...] = out.astype(o_ref.dtype)


def _round_up(n, m):
    return ((n + m - 1) // m) * m


def prepare_rownet_params(w1, b1, w2, b2, w3, b3):
    """One-time relayout (run eagerly, outside jit / once at init):
    PyTorch (out, in) weights -> (in, out); biases (out,) -> (1, out)."""
    return (
        jnp.asarray(w1).T, jnp.asarray(b1).reshape(1, -1),
        jnp.asarray(w2).T, jnp.asarray(b2).reshape(1, -1),
        jnp.asarray(w3).T, jnp.asarray(b3).reshape(1, -1),
    )


def _choose_tile(batch, block_batch):
    # Aim for >=2 grid steps (v7x has 2 TensorCores) while keeping the tile a
    # multiple of 8 and no larger than block_batch.
    half = _round_up(-(-batch // 2), 8)          # cdiv(batch, 2), rounded to 8
    tb = max(8, min(block_batch, half))
    if tb >= batch:
        tb = batch                               # single full-extent block
    return tb


@functools.partial(jax.jit, static_argnames=("block_batch",))
def rownet_forward(x, w1t, b1r, w2t, b2r, w3t, b3r, *, block_batch=512):
    """x: (batch, in).  w*t: pre-transposed (in, out).  b*r: (1, out)."""
    batch, in_dim = x.shape
    emb = w3t.shape[1]

    tb = _choose_tile(batch, block_batch)
    grid = (pl.cdiv(batch, tb),)                 # partial last block is masked
    resident = lambda i: (0, 0)                  # weights / biases VMEM-resident

    flops = 2 * batch * (2 * in_dim * in_dim + in_dim * emb)
    bytes_accessed = (
        batch * in_dim * 4                          # x
        + (2 * in_dim * in_dim + in_dim * emb) * 4  # weights
        + (2 * in_dim + emb) * 4                    # biases
        + batch * emb * 4                           # out
    )

    # VMEM: double-buffered x/out tiles + (double-buffered) resident params + headroom.
    vmem_bytes = (
        2 * tb * (in_dim + emb) * 4
        + 2 * (2 * in_dim * in_dim + in_dim * emb + 2 * in_dim + emb) * 4
        + (4 << 20)
    )
    vmem_bytes = int(min(max(vmem_bytes, 16 << 20), 64 << 20))

    out = pl.pallas_call(
        rownet_kernel,
        out_shape=jax.ShapeDtypeStruct((batch, emb), jnp.float32),
        grid=grid,
        in_specs=[
            pl.BlockSpec((tb, in_dim), lambda i: (i, 0)),   # x tile per step
            pl.BlockSpec((in_dim, in_dim), resident),       # w1^T
            pl.BlockSpec((1, in_dim), resident),            # b1
            pl.BlockSpec((in_dim, in_dim), resident),       # w2^T
            pl.BlockSpec((1, in_dim), resident),            # b2
            pl.BlockSpec((in_dim, emb), resident),          # w3^T
            pl.BlockSpec((1, emb), resident),               # b3
        ],
        out_specs=pl.BlockSpec((tb, emb), lambda i: (i, 0)),
        compiler_params=pltpu.CompilerParams(
            dimension_semantics=("parallel",),
            vmem_limit_bytes=vmem_bytes,
        ),
        cost_estimate=pl.CostEstimate(
            flops=flops, transcendentals=0, bytes_accessed=bytes_accessed
        ),
    )(x, w1t, b1r, w2t, b2r, w3t, b3r)

    return out


def rownet_reference(x, w1, b1, w2, b2, w3, b3):
    h = x @ w1.T + b1
    h = jnp.where(h > 0, h, 0.2 * h)
    h = h @ w2.T + b2
    h = jnp.where(h > 0, h, 0.2 * h)
    return h @ w3.T + b3


if __name__ == "__main__":
    batch = 200            # not a multiple of the tile -> exercises masked partial block
    input_size = 128
    embedded_dim = 256     # scaled-down stand-in for 1024 (!= input_size to catch layout bugs)

    key = jax.random.PRNGKey(0)
    kx, k1, k2, k3, kb1, kb2, kb3 = jax.random.split(key, 7)

    x = jax.random.normal(kx, (batch, input_size), dtype=jnp.float32)

    # PyTorch Linear weight layout: (out_features, in_features).
    w1 = jax.random.normal(k1, (input_size, input_size), dtype=jnp.float32) * 0.02
    b1 = jax.random.normal(kb1, (input_size,), dtype=jnp.float32) * 0.02
    w2 = jax.random.normal(k2, (input_size, input_size), dtype=jnp.float32) * 0.02
    b2 = jax.random.normal(kb2, (input_size,), dtype=jnp.float32) * 0.02
    w3 = jax.random.normal(k3, (embedded_dim, input_size), dtype=jnp.float32) * 0.02
    b3 = jax.random.normal(kb3, (embedded_dim,), dtype=jnp.float32) * 0.02

    # One-time relayout at "init" time (outside the jitted per-call path).
    params = prepare_rownet_params(w1, b1, w2, b2, w3, b3)
    params = jax.block_until_ready(params)

    out = rownet_forward(x, *params)
    out = jax.block_until_ready(out)

    ref = rownet_reference(x, w1, b1, w2, b2, w3, b3)
    assert out.shape == (batch, embedded_dim), out.shape
    assert jnp.allclose(out, ref, atol=1e-4, rtol=1e-4), float(jnp.max(jnp.abs(out - ref)))

    print("KERNEL_OK")
</pallas_src>

<mosaic_0001>
module attributes {stable_mosaic.version = 11 : i64} {
  func.func @rownet_kernel(%arg0: i32, %arg1: memref<104x128xf32, #tpu.memory_space<vmem>>, %arg2: memref<128x128xf32, #tpu.memory_space<vmem>>, %arg3: memref<1x128xf32, #tpu.memory_space<vmem>>, %arg4: memref<128x128xf32, #tpu.memory_space<vmem>>, %arg5: memref<1x128xf32, #tpu.memory_space<vmem>>, %arg6: memref<128x256xf32, #tpu.memory_space<vmem>>, %arg7: memref<1x256xf32, #tpu.memory_space<vmem>>, %arg8: memref<104x256xf32, #tpu.memory_space<vmem>>) attributes {dimension_semantics = [#tpu.dimension_semantics<parallel>], iteration_bounds = array<i64: 2>, scalar_prefetch = 0 : i64, scratch_operands = 0 : i64, tpu.core_type = #tpu.core_type<tc>, window_params = [{transform_indices = @transform_0, window_bounds = array<i64: 104, 128>}, {pipeline_mode = #tpu.pipeline_mode<synchronous>, transform_indices = @transform_1, window_bounds = array<i64: 128, 128>}, {pipeline_mode = #tpu.pipeline_mode<synchronous>, transform_indices = @transform_2, window_bounds = array<i64: 1, 128>}, {pipeline_mode = #tpu.pipeline_mode<synchronous>, transform_indices = @transform_3, window_bounds = array<i64: 128, 128>}, {pipeline_mode = #tpu.pipeline_mode<synchronous>, transform_indices = @transform_4, window_bounds = array<i64: 1, 128>}, {pipeline_mode = #tpu.pipeline_mode<synchronous>, transform_indices = @transform_5, window_bounds = array<i64: 128, 256>}, {pipeline_mode = #tpu.pipeline_mode<synchronous>, transform_indices = @transform_6, window_bounds = array<i64: 1, 256>}, {transform_indices = @transform_7, window_bounds = array<i64: 104, 256>}]} {
    %c0 = arith.constant 0 : index
    %c0_0 = arith.constant 0 : index
    %0 = vector.load %arg1[%c0, %c0_0] : memref<104x128xf32, #tpu.memory_space<vmem>>, vector<104x128xf32>
    %c0_1 = arith.constant 0 : index
    %c0_2 = arith.constant 0 : index
    %1 = vector.load %arg2[%c0_1, %c0_2] : memref<128x128xf32, #tpu.memory_space<vmem>>, vector<128x128xf32>
    %cst = arith.constant dense<0.000000e+00> : vector<104x128xf32>
    %2 = tpu.matmul %0, %1, %cst {dimension_numbers = #tpu.dot_dimension_numbers<[1], [0], [0], [1], [0, 0, 1, 1], [], []>} : vector<104x128xf32>, vector<128x128xf32>, vector<104x128xf32> -> vector<104x128xf32>
    %c0_3 = arith.constant 0 : index
    %c0_4 = arith.constant 0 : index
    %3 = vector.load %arg3[%c0_3, %c0_4] : memref<1x128xf32, #tpu.memory_space<vmem>>, vector<1x128xf32>
    %4 = vector.broadcast %3 : vector<1x128xf32> to vector<104x128xf32>
    %5 = arith.addf %2, %4 : vector<104x128xf32>
    %cst_5 = arith.constant 2.000000e-01 : f32
    %6 = vector.broadcast %cst_5 : f32 to vector<104x128xf32>
    %7 = arith.mulf %6, %5 : vector<104x128xf32>
    %8 = arith.maximumf %5, %7 : vector<104x128xf32>
    %c0_6 = arith.constant 0 : index
    %c0_7 = arith.constant 0 : index
    %9 = vector.load %arg4[%c0_6, %c0_7] : memref<128x128xf32, #tpu.memory_space<vmem>>, vector<128x128xf32>
    %cst_8 = arith.constant dense<0.000000e+00> : vector<104x128xf32>
    %10 = tpu.matmul %8, %9, %cst_8 {dimension_numbers = #tpu.dot_dimension_numbers<[1], [0], [0], [1], [0, 0, 1, 1], [], []>} : vector<104x128xf32>, vector<128x128xf32>, vector<104x128xf32> -> vector<104x128xf32>
    %c0_9 = arith.constant 0 : index
    %c0_10 = arith.constant 0 : index
    %11 = vector.load %arg5[%c0_9, %c0_10] : memref<1x128xf32, #tpu.memory_space<vmem>>, vector<1x128xf32>
    %12 = vector.broadcast %11 : vector<1x128xf32> to vector<104x128xf32>
    %13 = arith.addf %10, %12 : vector<104x128xf32>
    %cst_11 = arith.constant 2.000000e-01 : f32
    %14 = vector.broadcast %cst_11 : f32 to vector<104x128xf32>
    %15 = arith.mulf %14, %13 : vector<104x128xf32>
    %16 = arith.maximumf %13, %15 : vector<104x128xf32>
    %c0_12 = arith.constant 0 : index
    %c0_13 = arith.constant 0 : index
    %17 = vector.load %arg6[%c0_12, %c0_13] : memref<128x256xf32, #tpu.memory_space<vmem>>, vector<128x256xf32>
    %cst_14 = arith.constant dense<0.000000e+00> : vector<104x256xf32>
    %18 = tpu.matmul %16, %17, %cst_14 {dimension_numbers = #tpu.dot_dimension_numbers<[1], [0], [0], [1], [0, 0, 1, 1], [], []>} : vector<104x128xf32>, vector<128x256xf32>, vector<104x256xf32> -> vector<104x256xf32>
    %c0_15 = arith.constant 0 : index
    %c0_16 = arith.constant 0 : index
    %19 = vector.load %arg7[%c0_15, %c0_16] : memref<1x256xf32, #tpu.memory_space<vmem>>, vector<1x256xf32>
    %20 = vector.broadcast %19 : vector<1x256xf32> to vector<104x256xf32>
    %21 = arith.addf %18, %20 : vector<104x256xf32>
    %c0_17 = arith.constant 0 : index
    %c0_18 = arith.constant 0 : index
    %22 = vector.load %arg8[%c0_17, %c0_18] : memref<104x256xf32, #tpu.memory_space<vmem>>, vector<104x256xf32>
    tpu.vector_store %arg8[%c0_17, %c0_18], %21 {strides = array<i32>} : memref<104x256xf32, #tpu.memory_space<vmem>>, vector<104x256xf32>,
    return
  }
  func.func @transform_0(%arg0: i32) -> (i32, i32) {
    %c0_i32 = arith.constant 0 : i32
    %c0_i32_0 = arith.constant 0 : i32
    return %arg0, %c0_i32 : i32, i32
  }
  func.func @transform_1(%arg0: i32) -> (i32, i32) {
    %c0_i32 = arith.constant 0 : i32
    %c0_i32_0 = arith.constant 0 : i32
    %c0_i32_1 = arith.constant 0 : i32
    return %c0_i32, %c0_i32_0 : i32, i32
  }
  func.func @transform_2(%arg0: i32) -> (i32, i32) {
    %c0_i32 = arith.constant 0 : i32
    %c0_i32_0 = arith.constant 0 : i32
    %c0_i32_1 = arith.constant 0 : i32
    return %c0_i32, %c0_i32_0 : i32, i32
  }
  func.func @transform_3(%arg0: i32) -> (i32, i32) {
    %c0_i32 = arith.constant 0 : i32
    %c0_i32_0 = arith.constant 0 : i32
    %c0_i32_1 = arith.constant 0 : i32
    return %c0_i32, %c0_i32_0 : i32, i32
  }
  func.func @transform_4(%arg0: i32) -> (i32, i32) {
    %c0_i32 = arith.constant 0 : i32
    %c0_i32_0 = arith.constant 0 : i32
    %c0_i32_1 = arith.constant 0 : i32
    return %c0_i32, %c0_i32_0 : i32, i32
  }
  func.func @transform_5(%arg0: i32) -> (i32, i32) {
    %c0_i32 = arith.constant 0 : i32
    %c0_i32_0 = arith.constant 0 : i32
    %c0_i32_1 = arith.constant 0 : i32
    return %c0_i32, %c0_i32_0 : i32, i32
  }
  func.func @transform_6(%arg0: i32) -> (i32, i32) {
    %c0_i32 = arith.constant 0 : i32
    %c0_i32_0 = arith.constant 0 : i32
    %c0_i32_1 = arith.constant 0 : i32
    return %c0_i32, %c0_i32_0 : i32, i32
  }
  func.func @transform_7(%arg0: i32) -> (i32, i32) {
    %c0_i32 = arith.constant 0 : i32
    %c0_i32_0 = arith.constant 0 : i32
    return %arg0, %c0_i32 : i32, i32
  }
}

</mosaic_0001>

<bundles_post_ra>
// kernel: rownet_forward.1
= control target key start
LH: loop header
LB: loop body
LE: loop exit
PB: predicated region body
PF: predicated region fallthrough
CT: control target
= control target key end

     0   :  { %s2195_s0 = inlined_call_operand.hbm [shape: f32[200,128], index: 0, kind: input, shape index: {}]   ;;  %s2196_s1 = inlined_call_operand.hbm [shape: f32[128,128], index: 1, kind: input, shape index: {}]   ;;  %s2197_s2 = inlined_call_operand.vmem [shape: f32[1,128], index: 2, kind: input, shape index: {}]   ;;  %s2198_s3 = inlined_call_operand.hbm [shape: f32[128,128], index: 3, kind: input, shape index: {}]   ;;  %s2199_s4 = inlined_call_operand.vmem [shape: f32[1,128], index: 4, kind: input, shape index: {}]   ;;  %s2200_s5 = inlined_call_operand.hbm [shape: f32[128,256], index: 5, kind: input, shape index: {}]   ;;  %s2201_s6 = inlined_call_operand.vmem [shape: f32[1,256], index: 6, kind: input, shape index: {}]   ;;  %s2202_s7 = inlined_call_operand.hbm [shape: f32[200,256], index: 7, kind: output, shape index: {}]  }
   0x1   :  { %2210 = sst [smem:[#allocation19_spill]] %s2196_s1 }
   0x2   :  { %12 = vsyncpa [#allocation3], 0 }
   0x3   :  { %14 = vsyncpa [#allocation3 + $0x1], 0 }
   0x4   :  { %15 = vsyncpa [#allocation6], 0 }
   0x5   :  { %16 = vsyncpa [#allocation9], 0 }
   0x6   :  { %17 = vsyncpa [#allocation4], 0 }
   0x7   :  { %19 = vsyncpa [#allocation4 + $0x1], 0  ;;  %s1721_s24 = smov 0   ;;  %s1723_s25 = smov 0  }
   0x8   :  { %s1725_s26 = smov 0   ;;  %s1727_s27 = smov 0  }
   0x9 LB: > { %2211 = sst [smem:[#allocation15_spill]] %s1651_s24  ;;  %s1742_s28 = sadd.s32 4294967295, %s1663_s27   ;;  %s1663_s27 = sphi %s1727_s27, %s2234_s27   ;;  %s1659_s26 = sphi %s1725_s26, %s2238_s26   ;;  %s1655_s25 = sphi %s1723_s25, %s2237_s25   ;;  %s1651_s24 = sphi %s1721_s24, %s2236_s24  }
   0xa   : > { %s1066_s29 = sadd.s32 4294967294, %s1663_s27   ;;  %s1746_s30 = sadd.s32 1, %s1663_s27  }
   0xb   : > { %2212 = sst [smem:[#allocation16_spill]] %s1746_s30  ;;  %s32_s8 = sadd.s32 1, %s1659_s26 }
   0xc   : > { %s29_s9 = ssub.s32 %s1663_s27, %s1746_s30  ;;  %p39_p0 = scmp.ne.s32.totalorder %s1659_s26, %s1655_s25 }
   0xd   : > { %p30_p1 = scmp.eq.s32.totalorder %s29_s9, 0  ;;  %p40_p2 = scmp.eq.s32.totalorder %s1663_s27, 0 }
   0xe   : > { %p45_p3 = scmp.ne.s32.totalorder %s1655_s25, %s1651_s24  ;;  %p2203_p4 = scmp.eq.s32.totalorder %s1742_s28, 0 }
   0xf   : > { %s1758_s10 = scalar_select %p30_p1, %s1659_s26, %s32_s8  }
  0x10   : > { %p1760_p5 = por %p40_p2, %p39_p0  ;;  %p1766_p6 = por %p2203_p4, %p45_p3 }
  0x11   : > { %2213 = sst [smem:[#allocation17_spill]] %s1758_s10  ;;  %p195_p7 = scmp.eq.s32.totalorder %s1742_s28, 1 }
  0x12   : > { %s2214_s11 = scalar_select %p1760_p5, 1, 0 }
  0x13   : > { %s2215_s12 = scalar_select %p1766_p6, 1, 0 }
  0x14   : > { %p201_p8 = scmp.eq.s32.totalorder %s1066_s29, 1  ;;  %p1067_p9 = scmp.ge.s32.totalorder %s1663_s27, 1 }
  0x15   : > { %p208_p10 = scmp.lt.s32.totalorder %s1663_s27, 3  ;;  %p1773_p11 = por %p195_p7, %p39_p0 }
  0x16   : > { %p1777_p12 = por %p201_p8, %p45_p3  ;;  %s1665_s16 = smov [#allocation5]  }
  0x17   : > { %s2216_s13 = scalar_select %p1773_p11, 1, 0 }
  0x18   : > { %s2217_s14 = scalar_select %p1777_p12, 1, 0 }
  0x19   : > { %p1781_p13 = pnand %p1067_p9, %p208_p10  ;;  %s220_s17 = sshll.u32 %s1665_s16, 4  ;;  %s221_s17 = int_to_ptr.vmem [resolvable:$true] %s220_s17 }
  0x1a   : > { %2218 = sst [smem:[#allocation18_spill]] %s2217_s14  ;;  %s1666_s19 = smov [#allocation7]  }
  0x1b   : > { %s2219_s15 = scalar_select %p1781_p13, 1, 0 }
  0x1c   : > { %p1410_p1 = pneg %p1781_p13  ;;  %s236_s20 = sshll.u32 %s1666_s19, 4  ;;  %s1793_s20 = int_to_ptr.vmem [resolvable:$true] %s236_s20 }
  0x1d   : > { %s2221_s1 = sld [smem:[#allocation19_spill]] }
  0x1e   : > { %p1789_p2 = pnand %p1410_p1, %p2203_p4 }
  0x20   : > { %p1803_p3 = pneg %p1789_p2 }
  0x23   : > { %s1477_s23 = scalar_lea.hbm %s2221_s1, 2048 }
  0x24   : > { %p1478_p0 = scmp.ne.s32.totalorder %s2221_s1, %s1477_s23  ;;  %p1484_p9 = scmp.lt.u32.totalorder %s1477_s23, %s2221_s1 }
  0x26   : > { %p1480_p7 = pnand %p1803_p3, %p1478_p0 }
  0x28   : > { %p1481_p8 = pneg %p1480_p7 }
  0x2a   : > { %p1486_p10 = pnand %p1484_p9, %p1481_p8 }
  0x2c   : > { %1489 = shalt.err (!%p1486_p10)
}
  0x2d   : > { %s1490_s21 = scalar_lea.vmem %s221_s17, 2048  ;;  %p1498_p11 = scmp.lt.s32.totalorder %s221_s17, %s221_s17 }
  0x2e   : > { %p1491_p1 = scmp.ne.s32.totalorder %s221_s17, %s1490_s21  ;;  %p1499_p6 = scmp.lt.s32.totalorder %s1490_s21, %s1490_s21 }
  0x30   : > { %p1493_p4 = pnand %p1491_p1, %p1803_p3  ;;  %p1500_p13 = por %p1499_p6, %p1498_p11 }
  0x32   : > { %p1494_p12 = pneg %p1493_p4 }
  0x34   : > { %p1501_p5 = pnand %p1500_p13, %p1494_p12 }
  0x36   : > { %1504 = shalt.err (!%p1501_p5)
}
  0x37   : > { %s1667_s22 = smov 128   ;;  %s1668_s29 = smov 8  }
  0x38   : > { %1413 = dma.hbm_to_vmem [thread:$0]  (!%p1789_p2), %s2221_s1, 2048, %s221_s17, [#allocation6], %s1667_s22, %s1667_s22, %s1668_s29  }
  0x39   : > { %s1505_s10 = scalar_lea.hbm %s2198_s3, 2048 }
  0x3a   : > { %p1506_p4 = scmp.ne.s32.totalorder %s2198_s3, %s1505_s10  ;;  %p1512_p11 = scmp.lt.u32.totalorder %s1505_s10, %s2198_s3 }
  0x3c   : > { %p1508_p6 = pnand %p1506_p4, %p1803_p3 }
  0x3e   : > { %p1509_p5 = pneg %p1508_p6 }
  0x40   : > { %p1514_p12 = pnand %p1512_p11, %p1509_p5 }
  0x42   : > { %1517 = shalt.err (!%p1514_p12)
}
  0x43   : > { %s1518_s17 = scalar_lea.vmem %s1793_s20, 2048  ;;  %p1526_p8 = scmp.lt.s32.totalorder %s1793_s20, %s1793_s20 }
  0x44   : > { %p1519_p13 = scmp.ne.s32.totalorder %s1793_s20, %s1518_s17  ;;  %p1527_p9 = scmp.lt.s32.totalorder %s1518_s17, %s1518_s17 }
  0x46   : > { %p1521_p0 = pnand %p1519_p13, %p1803_p3  ;;  %p1528_p10 = por %p1527_p9, %p1526_p8 }
  0x48   : > { %p1522_p7 = pneg %p1521_p0 }
  0x4a   : > { %p1529_p1 = pnand %p1528_p10, %p1522_p7 }
  0x4c   : > { %1532 = shalt.err (!%p1529_p1)
}
  0x4d   : > { %1416 = dma.hbm_to_vmem [thread:$0]  (!%p1789_p2), %s2198_s3, 2048, %s1793_s20, [#allocation6], %s1667_s22, %s1667_s22, %s1668_s29  }
  0x4e   : > { %s1669_s10 = smov [#allocation8]   ;;  %s1533_s16 = scalar_lea.hbm %s2200_s5, 4096 }
  0x4f   : > { %s252_s14 = sshll.u32 %s1669_s10, 4  ;;  %p1534_p4 = scmp.ne.s32.totalorder %s2200_s5, %s1533_s16  ;;  %s253_s14 = int_to_ptr.vmem [resolvable:$true] %s252_s14 }
  0x50   : > { %p1540_p11 = scmp.lt.u32.totalorder %s1533_s16, %s2200_s5 }
  0x51   : > { %p1536_p6 = pnand %p1534_p4, %p1803_p3 }
  0x53   : > { %p1537_p5 = pneg %p1536_p6 }
  0x55   : > { %p1542_p12 = pnand %p1540_p11, %p1537_p5 }
  0x57   : > { %1545 = shalt.err (!%p1542_p12)
}
  0x58   : > { %s1546_s20 = scalar_lea.vmem %s253_s14, 4096  ;;  %p1554_p8 = scmp.lt.s32.totalorder %s253_s14, %s253_s14 }
  0x59   : > { %p1547_p13 = scmp.ne.s32.totalorder %s253_s14, %s1546_s20  ;;  %p1555_p9 = scmp.lt.s32.totalorder %s1546_s20, %s1546_s20 }
  0x5b   : > { %p1549_p0 = pnand %p1547_p13, %p1803_p3  ;;  %p1556_p10 = por %p1555_p9, %p1554_p8 }
  0x5d   : > { %p1550_p7 = pneg %p1549_p0 }
  0x5f   : > { %p1557_p1 = pnand %p1556_p10, %p1550_p7 }
  0x61   : > { %1560 = shalt.err (!%p1557_p1)
}
  0x62   : > { %s1670_s22 = smov 256   ;;  %s1671_s29 = smov 16  }
  0x63   : > { %1419 = dma.hbm_to_vmem [thread:$0]  (!%p1789_p2), %s2200_s5, 4096, %s253_s14, [#allocation9], %s1670_s22, %s1670_s22, %s1671_s29  }
  0x64   : > { %p1071_p4 = scmp.ge.s32.totalorder %s1663_s27, 2 }
  0x65   : > { %p2223_p3 = scmp.ne.s32.totalorder (!%p1071_p4), %s2214_s11, 0 }
  0x66   : > { %265 = sbr.rel (%p1071_p4) target bundleno = 144 (0x90), region = 40 }
  0x6d   : > { %268 = sbr.rel (!%p2223_p3) target bundleno = 144 (0x90), region = 44  ;;  %s269_s9 = sand.u32 (%p2223_p3), 1, %s1659_s26  }
  0x6e   : > { %s274_s30 = smul.u32 (%p2223_p3), 13, %s1663_s27  ;;  %s1870_s23 = scalar_lea.sflag (%p2223_p3), [#allocation3], %s269_s9 }
  0x6f   : > { %s1393_s10 = smul.u32 (%p2223_p3), 104, %s269_s9 }
  0x70   : > { %s275_s8 = ssub.s32 (%p2223_p3), 25, %s274_s30 }
  0x71   : > { %p276_p6 = scmp.lt.s32.totalorder (%p2223_p3), %s275_s8, 13  ;;  %s273_s16 = scalar_lea.vmem (%p2223_p3), [#allocation2], %s1393_s10 }
  0x74   : > { %s2240_s8 = smov (!%p276_p6, %s275_s8), 13 }
  0x75   : > { %s1867_s18 = sshll.u32 %s2240_s8, 7 }
  0x76   : > { %s280_s14 = ssub.s32 1664, %s1867_s18 }
  0x77   : > { %281 = vsyncadd %s1870_s23, %s280_s14  ;;  %p1073_p2 = scmp.ne.s32.totalorder %s1867_s18, 0  ;;  %s1092_s11 = smul.u32 1664, %s1663_s27 }
  0x78   : > { %s286_s19 = sshll.u32 %s273_s16, 4  ;;  %s1565_s1 = scalar_lea.hbm %s2195_s0, 3200  ;;  %s1880_s19 = int_to_ptr.vmem [resolvable:$true] %s286_s19 }
  0x79   : > { %s1878_s20 = scalar_lea.hbm %s2195_s0, %s1092_s11 }
  0x7a   : > { %s1561_s22 = scalar_lea.hbm %s1878_s20, %s1867_s18  ;;  %p1566_p13 = scmp.lt.u32.totalorder %s1878_s20, %s2195_s0 }
  0x7b   : > { %p1562_p5 = scmp.ne.s32.totalorder %s1878_s20, %s1561_s22  ;;  %p1567_p0 = scmp.lt.u32.totalorder %s1565_s1, %s1561_s22 }
  0x7c   : > { %p1569_p8 = scmp.lt.u32.totalorder %s1561_s22, %s1878_s20 }
  0x7d   : > { %p1563_p11 = pnand %p1562_p5, %p1073_p2  ;;  %p1568_p7 = por %p1567_p0, %p1566_p13 }
  0x7f   : > { %p1564_p12 = pneg %p1563_p11  ;;  %p1570_p9 = por %p1569_p8, %p1568_p7 }
  0x81   : > { %p1571_p10 = pnand %p1570_p9, %p1564_p12 }
  0x83   : > { %1574 = shalt.err (!%p1571_p10)
}
  0x84   : > { %s1575_s10 = scalar_lea.vmem %s1880_s19, %s1867_s18  ;;  %s1672_s8 = smov [#allocation2]  }
  0x85   : > { %p1576_p1 = scmp.ne.s32.totalorder %s1880_s19, %s1575_s10  ;;  %s1579_s14 = sshll.u32 %s1672_s8, 4  ;;  %s1580_s14 = int_to_ptr.vmem [resolvable:$false] %s1579_s14 }
  0x86   : > { %s1581_s16 = scalar_lea.vmem %s1580_s14, 3328  ;;  %p1582_p5 = scmp.lt.s32.totalorder %s1880_s19, %s1580_s14 }
  0x87   : > { %p1577_p3 = pnand %p1576_p1, %p1073_p2  ;;  %p1583_p11 = scmp.lt.s32.totalorder %s1581_s16, %s1575_s10 }
  0x89   : > { %p1578_p6 = pneg %p1577_p3  ;;  %p1584_p13 = por %p1583_p11, %p1582_p5 }
  0x8b   : > { %p1585_p0 = pnand %p1584_p13, %p1578_p6 }
  0x8d   : > { %1588 = shalt.err (!%p1585_p0)
}
  0x8e   : > { %s1673_s11 = smov 128   ;;  %s1674_s21 = smov 8  }
  0x8f   : > { %292 = dma.hbm_to_vmem [thread:$0]  (%p1073_p2), %s1878_s20, %s1867_s18, %s1880_s19, %s1870_s23, %s1673_s11, %s1673_s11, %s1674_s21  }
  0x90 PF: > { %p2224_p12 = scmp.ne.s32.totalorder %s2219_s15, 0 }
  0x91   : > { %s1910_s17 = sand.u32 (!%p2224_p12), 1, %s1655_s25   ;;  %p2225_p7 = scmp.ne.s32.totalorder (!%p2224_p12), %s2215_s12, 0 }
  0x92   : > { %298 = sbr.rel (%p2224_p12) target bundleno = 922 (0x39a), region = 48  ;;  %s301_s29 = scalar_lea.sflag (!%p2224_p12), [#allocation3], %s1910_s17 }
  0x93   : > { %s1394_s22 = smul.u32 (!%p2224_p12), 104, %s1910_s17 }
  0x95   : > { %s1914_s24 = scalar_lea.vmem (!%p2224_p12), [#allocation2], %s1394_s22 }
  0x99   : > { %1634 = dma.done.wait (%p2225_p7), %s301_s29, 1664  }
  0x9a   : > { %1636 = vsyncadd (%p2225_p7), %s301_s29, 4294965632  ;;  %p2226_p2 = scmp.eq.s32.totalorder %s1742_s28, 0 }
  0x9c   : > { %1638 = dma.done.wait (%p2226_p2), [#allocation6], 4096   ;;  %p2227_p8 = pmov %p2226_p2 }
  0x9d   : > { %p2228_p9 = pmov %p2226_p2 }
  0x9e   : > { %1640 = vsyncadd (%p2227_p8), [#allocation6], 4294963200 }
  0x9f   : > { %1642 = dma.done.wait (%p2228_p9), [#allocation9], 4096   ;;  %p2229_p10 = pmov %p2226_p2 }
  0xa0   : > { %v1675_v0 = vmov 0.0|0.0   ;;  %vm1676_vm0 = vmmov 0   ;;  %v1677_v1 = vmov 0.0   ;;  %v371_v2 = vld [vmem:[#allocation5] sm:$0xff]  ;;  %v372_v3 = vld [vmem:[#allocation5 + $0x8] sm:$0xff]  ;;  %v373_v4 = vld [vmem:[#allocation5 + $0x10] sm:$0xff] }
  0xa1   : > { %1644 = vsyncadd (%p2229_p10), [#allocation9], 4294963200  ;;  %1297 = vmatprep.subr.bf16.mxu0 %v1675_v0  ;;  %1187 = vmatprep.mubr.msk.f32.mxu0 %vm1676_vm0, %v1677_v1  ;;  %v1298_v5 = vpack.c.bf16 %v372_v3, %v371_v2  ;;  %v374_v6 = vld [vmem:[#allocation5 + $0x18] sm:$0xff]  ;;  %v375_v8 = vld [vmem:[#allocation5 + $0x20] sm:$0xff]  ;;  %s1395_s1 = smul.u32 208, %s1910_s17  ;;  %s943_s30 = scalar_lea.sflag [#allocation4], %s1910_s17 }
  0xa2   : > { %1321 = vmatprep.subr.bf16.mxu1 %v1675_v0  ;;  %1258 = vmatprep.mubr.msk.f32.mxu1 %vm1676_vm0, %v1677_v1  ;;  %v1301_v7 = vpack.c.bf16 %v374_v6, %v373_v4  ;;  %v376_v9 = vld [vmem:[#allocation5 + $0x28] sm:$0xff]  ;;  %v377_v11 = vld [vmem:[#allocation5 + $0x30] sm:$0xff]  ;;  %v378_v12 = vld [vmem:[#allocation5 + $0x38] sm:$0xff]  ;;  %p2230_p1 = scmp.ne.s32.totalorder %s2216_s13, 0 }
  0xa3   : > { %1299 = vmatpush3.bf16.msra.mxu0 %v1298_v5  ;;  %v1304_v10 = vpack.c.bf16 %v376_v9, %v375_v8  ;;  %v550_v13 = vld [vmem:[#allocation7] sm:$0xff]  ;;  %v551_v14 = vld [vmem:[#allocation7 + $0x8] sm:$0xff]  ;;  %v552_v15 = vld [vmem:[#allocation7 + $0x10] sm:$0xff]  ;;  %v1307_v17 = vpack.c.bf16 %v378_v12, %v377_v11  ;;  %s2080_s9 = scalar_lea.vmem [#allocation10], %s1395_s1  ;;  %s950_s10 = smul.u32 (%p2230_p1), 13, %s1742_s28 }
  0xa4   : > { %1300 = vmatprep.subr.bf16.mxu0 %v1675_v0  ;;  %v553_v16 = vld [vmem:[#allocation7 + $0x18] sm:$0xff]  ;;  %v1322_v18 = vpack.c.bf16 %v551_v14, %v550_v13  ;;  %v379_v19 = vld [vmem:[#allocation5 + $0x40] sm:$0xff]  ;;  %v380_v20 = vld [vmem:[#allocation5 + $0x48] sm:$0xff] }
  0xa5   : > { %v1325_v21 = vpack.c.bf16 %v553_v16, %v552_v15  ;;  %v554_v22 = vld [vmem:[#allocation7 + $0x20] sm:$0xff]  ;;  %v555_v23 = vld [vmem:[#allocation7 + $0x28] sm:$0xff]  ;;  %v1310_v24 = vpack.c.bf16 %v380_v20, %v379_v19  ;;  %v381_v25 = vld [vmem:[#allocation5 + $0x50] sm:$0xff]  ;;  %s951_s8 = ssub.s32 (%p2230_p1), 25, %s950_s10 }
  0xa6   : > { %1323 = vmatpush3.bf16.msra.mxu1 %v1322_v18  ;;  %v382_v26 = vld [vmem:[#allocation5 + $0x58] sm:$0xff]  ;;  %v1328_v27 = vpack.c.bf16 %v555_v23, %v554_v22  ;;  %v556_v28 = vld [vmem:[#allocation7 + $0x30] sm:$0xff]  ;;  %v383_v31 = vld [vmem:[#allocation5 + $0x60] sm:$0xff]  ;;  %p952_p3 = scmp.lt.s32.totalorder (%p2230_p1), %s951_s8, 13 }
  0xa7   : > { %1302 = vmatpush3.bf16.msra.mxu0 %v1301_v7  ;;  %1324 = vmatprep.subr.bf16.mxu1 %v1675_v0  ;;  %v557_v29 = vld [vmem:[#allocation7 + $0x38] sm:$0xff]  ;;  %v1313_v30 = vpack.c.bf16 %v382_v26, %v381_v25  ;;  %v384_v32 = vld [vmem:[#allocation5 + $0x68] sm:$0xff]  ;;  %v558_v34 = vld [vmem:[#allocation7 + $0x40] sm:$0xff] }
  0xa8   : > { %1303 = vmatprep.subr.bf16.mxu0 %v1675_v0  ;;  %v1331_v33 = vpack.c.bf16 %v557_v29, %v556_v28  ;;  %v559_v35 = vld [vmem:[#allocation7 + $0x48] sm:$0xff]  ;;  %v1316_v36 = vpack.c.bf16 %v384_v32, %v383_v31  ;;  %v385_v37 = vld [vmem:[#allocation5 + $0x70] sm:$0xff]  ;;  %v386_v38 = vld [vmem:[#allocation5 + $0x78] sm:$0xff] }
  0xa9   : > { %v1334_v39 = vpack.c.bf16 %v559_v35, %v558_v34  ;;  %v560_v40 = vld [vmem:[#allocation7 + $0x50] sm:$0xff]  ;;  %v561_v41 = vld [vmem:[#allocation7 + $0x58] sm:$0xff]  ;;  %v1319_v42 = vpack.c.bf16 %v386_v38, %v385_v37  ;;  %v360_v46 = vld [vmem:[%s1914_s24 + $0x10] sm:$0xff] }
  0xaa   : > { %1326 = vmatpush3.bf16.msra.mxu1 %v1325_v21  ;;  %v1337_v43 = vpack.c.bf16 %v561_v41, %v560_v40  ;;  %v358_v44 = vld [vmem:[%s1914_s24] sm:$0xff]  ;;  %v359_v45 = vld [vmem:[%s1914_s24 + $0x8] sm:$0xff]  ;;  %v361_v47 = vld [vmem:[%s1914_s24 + $0x18] sm:$0xff] }
  0xab   : > { %1305 = vmatpush3.bf16.msra.mxu0 %v1304_v10  ;;  %1327 = vmatprep.subr.bf16.mxu1 %v1675_v0  ;;  %v362_v48 = vld [vmem:[%s1914_s24 + $0x20] sm:$0xff]  ;;  %v363_v49 = vld [vmem:[%s1914_s24 + $0x28] sm:$0xff]  ;;  %v364_v50 = vld [vmem:[%s1914_s24 + $0x30] sm:$0xff] }
  0xac   : > { %1306 = vmatprep.subr.bf16.mxu0 %v1675_v0  ;;  %v365_v51 = vld [vmem:[%s1914_s24 + $0x38] sm:$0xff]  ;;  %v366_v52 = vld [vmem:[%s1914_s24 + $0x40] sm:$0xff]  ;;  %v367_v53 = vld [vmem:[%s1914_s24 + $0x48] sm:$0xff] }
  0xad   : > { %v368_v54 = vld [vmem:[%s1914_s24 + $0x50] sm:$0xff]  ;;  %v369_v55 = vld [vmem:[%s1914_s24 + $0x58] sm:$0xff]  ;;  %v370_v56 = vld [vmem:[%s1914_s24 + $0x60] sm:$0xff] }
  0xae   : > { %1329 = vmatpush3.bf16.msra.mxu1 %v1328_v27  ;;  %v562_v57 = vld [vmem:[#allocation7 + $0x60] sm:$0xff]  ;;  %v563_v58 = vld [vmem:[#allocation7 + $0x68] sm:$0xff]  ;;  %v564_v60 = vld [vmem:[#allocation7 + $0x70] sm:$0xff] }
  0xaf   : > { %1308 = vmatpush3.bf16.msra.mxu0 %v1307_v17  ;;  %1330 = vmatprep.subr.bf16.mxu1 %v1675_v0  ;;  %v1340_v59 = vpack.c.bf16 %v563_v58, %v562_v57  ;;  %v565_v61 = vld [vmem:[#allocation7 + $0x78] sm:$0xff]  ;;  %v730_v63 = vld [vmem:[#allocation8 + $0x8] sm:$0xff]  ;;  %v729_v3 = vld [vmem:[#allocation8] sm:$0xff] }
  0xb0   : > { %1309 = vmatprep.subr.bf16.mxu0 %v1675_v0  ;;  %v1343_v62 = vpack.c.bf16 %v565_v61, %v564_v60  ;;  %v732_v2 = vld [vmem:[#allocation8 + $0x18] sm:$0xff]  ;;  %v731_v5 = vld [vmem:[#allocation8 + $0x10] sm:$0xff]  ;;  %v734_v6 = vld [vmem:[#allocation8 + $0x28] sm:$0xff] }
  0xb1   : > { %v1345_v4 = vpack.c.bf16 %v732_v2, %v730_v63  ;;  %v736_v7 = vld [vmem:[#allocation8 + $0x38] sm:$0xff]  ;;  %v1347_v8 = vpack.c.bf16 %v731_v5, %v729_v3  ;;  %v733_v10 = vld [vmem:[#allocation8 + $0x20] sm:$0xff]  ;;  %v735_v11 = vld [vmem:[#allocation8 + $0x30] sm:$0xff] }
  0xb2   : > { %1332 = vmatpush3.bf16.msra.mxu1 %v1331_v33  ;;  %v1349_v9 = vpack.c.bf16 %v736_v7, %v734_v6  ;;  %v738_v12 = vld [vmem:[#allocation8 + $0x48] sm:$0xff]  ;;  %v740_v13 = vld [vmem:[#allocation8 + $0x58] sm:$0xff]  ;;  %v737_v15 = vld [vmem:[#allocation8 + $0x40] sm:$0xff] }
  0xb3   : > { %1311 = vmatpush3.bf16.msra.mxu0 %v1310_v24  ;;  %1333 = vmatprep.subr.bf16.mxu1 %v1675_v0  ;;  %v1353_v14 = vpack.c.bf16 %v740_v13, %v738_v12  ;;  %v739_v16 = vld [vmem:[#allocation8 + $0x50] sm:$0xff]  ;;  %v742_v17 = vld [vmem:[#allocation8 + $0x68] sm:$0xff]  ;;  %v744_v18 = vld [vmem:[#allocation8 + $0x78] sm:$0xff] }
  0xb4   : > { %1312 = vmatprep.subr.bf16.mxu0 %v1675_v0  ;;  %v1355_v19 = vpack.c.bf16 %v739_v16, %v737_v15  ;;  %v1357_v20 = vpack.c.bf16 %v744_v18, %v742_v17  ;;  %v741_v21 = vld [vmem:[#allocation8 + $0x60] sm:$0xff]  ;;  %v743_v22 = vld [vmem:[#allocation8 + $0x70] sm:$0xff]  ;;  %v746_v23 = vld [vmem:[#allocation8 + $0x88] sm:$0xff] }
  0xb5   : > { %v748_v24 = vld [vmem:[#allocation8 + $0x98] sm:$0xff]  ;;  %v1359_v25 = vpack.c.bf16 %v743_v22, %v741_v21  ;;  %v745_v27 = vld [vmem:[#allocation8 + $0x80] sm:$0xff]  ;;  %v747_v28 = vld [vmem:[#allocation8 + $0x90] sm:$0xff] }
  0xb6   : > { %1335 = vmatpush3.bf16.msra.mxu1 %v1334_v39  ;;  %v1361_v26 = vpack.c.bf16 %v748_v24, %v746_v23  ;;  %v750_v29 = vld [vmem:[#allocation8 + $0xa8] sm:$0xff]  ;;  %v1363_v31 = vpack.c.bf16 %v747_v28, %v745_v27  ;;  %v749_v33 = vld [vmem:[#allocation8 + $0xa0] sm:$0xff]  ;;  %v751_v34 = vld [vmem:[#allocation8 + $0xb0] sm:$0xff] }
  0xb7   : > { %1314 = vmatpush3.bf16.msra.mxu0 %v1313_v30  ;;  %1336 = vmatprep.subr.bf16.mxu1 %v1675_v0  ;;  %v752_v30 = vld [vmem:[#allocation8 + $0xb8] sm:$0xff]  ;;  %v754_v35 = vld [vmem:[#allocation8 + $0xc8] sm:$0xff]  ;;  %v1988_v37 = vpack.c.bf16 %v751_v34, %v749_v33  ;;  %v1998_v39 = vld [vmem:[%s2197_s2] ss:$0 sm:$0xff] }
  0xb8   : > { %1315 = vmatprep.subr.bf16.mxu0 %v1675_v0  ;;  %v1986_v32 = vpack.c.bf16 %v752_v30, %v750_v29 }
  0xba   : > { %1338 = vmatpush3.bf16.msra.mxu1 %v1337_v43 }
  0xbb   : > { %1317 = vmatpush3.bf16.msra.mxu0 %v1316_v36  ;;  %1339 = vmatprep.subr.bf16.mxu1 %v1675_v0  ;;  %v756_v36 = vld [vmem:[#allocation8 + $0xd8] sm:$0xff] }
  0xbc   : > { %1318 = vmatprep.subr.bf16.mxu0 %v1675_v0  ;;  %v1991_v38 = vpack.c.bf16 %v756_v36, %v754_v35 }
  0xbe   : > { %1341 = vmatpush3.bf16.msra.mxu1 %v1340_v59 }
  0xbf   : > { %1320 = vmatpush3.bf16.msra.mxu0 %v1319_v42  ;;  %1342 = vmatprep.subr.bf16.mxu1 %v1675_v0  ;;  %v1351_v0 = vpack.c.bf16 %v735_v11, %v733_v10 }
  0xc0   : > { %1346 = vmatprep.subr.bf16.mxu0 %v1345_v4 }
  0xc2   : > { %1188 = vmatmul.mubr.f32.vlgmr.msra.gmra.mrb[0].mxu0 %v358_v44  ;;  %1344 = vmatpush3.bf16.msra.mxu1 %v1343_v62 }
  0xc3   : > { %1190 = vmatprep.mubr.msk.f32.mxu0 %vm1676_vm0, %v1677_v1  ;;  %1377 = vmatprep.subr.bf16.mxu1 %v1345_v4 }
  0xc4   : > { %1348 = vmatpush1.bf16.msra.mxu0 %v1347_v8 }
  0xc5   : > { %1350 = vmatprep.subr.bf16.mxu0 %v1349_v9 }
  0xc6   : > { %1191 = vmatmul.mubr.f32.gmra.mrb[2].mxu0 %v359_v45 }
  0xc7   : > { %1193 = vmatprep.mubr.msk.f32.mxu0 %vm1676_vm0, %v1677_v1 }
  0xc8   : > { %1352 = vmatpush1.bf16.msra.mxu0 %v1351_v0 }
  0xc9   : > { %1354 = vmatprep.subr.bf16.mxu0 %v1353_v14 }
  0xca   : > { %1194 = vmatmul.mubr.f32.gmra.mrb[4].mxu0 %v360_v46 }
  0xcb   : > { %1196 = vmatprep.mubr.msk.f32.mxu0 %vm1676_vm0, %v1677_v1 }
  0xcc   : > { %1356 = vmatpush1.bf16.msra.mxu0 %v1355_v19 }
  0xcd   : > { %1358 = vmatprep.subr.bf16.mxu0 %v1357_v20 }
  0xce   : > { %1197 = vmatmul.mubr.f32.gmra.mrb[6].mxu0 %v361_v47 }
  0xcf   : > { %1199 = vmatprep.mubr.msk.f32.mxu0 %vm1676_vm0, %v1677_v1 }
  0xd0   : > { %1360 = vmatpush1.bf16.msra.mxu0 %v1359_v25 }
  0xd1   : > { %1362 = vmatprep.subr.bf16.mxu0 %v1361_v26 }
  0xd2   : > { %1200 = vmatmul.mubr.f32.gmra.mrb[8].mxu0 %v362_v48 }
  0xd3   : > { %1202 = vmatprep.mubr.msk.f32.mxu0 %vm1676_vm0, %v1677_v1 }
  0xd4   : > { %1364 = vmatpush1.bf16.msra.mxu0 %v1363_v31 }
  0xd5   : > { %1366 = vmatprep.subr.bf16.mxu0 %v1986_v32 }
  0xd6   : > { %1203 = vmatmul.mubr.f32.gmra.mrb[10].mxu0 %v363_v49 }
  0xd7   : > { %1205 = vmatprep.mubr.msk.f32.mxu0 %vm1676_vm0, %v1677_v1 }
  0xd8   : > { %1368 = vmatpush1.bf16.msra.mxu0 %v1988_v37 }
  0xd9   : > { %1370 = vmatprep.subr.bf16.mxu0 %v1991_v38 }
  0xda   : > { %1206 = vmatmul.mubr.f32.gmra.mrb[12].mxu0 %v364_v50 }
  0xdb   : > { %1208 = vmatprep.mubr.msk.f32.mxu0 %vm1676_vm0, %v1677_v1 }
  0xde   : > { %1209 = vmatmul.mubr.f32.gmra.mrb[14].mxu0 %v365_v51 }
  0xdf   : > { %1211 = vmatprep.mubr.msk.f32.mxu0 %vm1676_vm0, %v1677_v1 }
  0xe2   : > { %1212 = vmatmul.mubr.f32.gmra.mrb[16].mxu0 %v366_v52 }
  0xe3   : > { %1214 = vmatprep.mubr.msk.f32.mxu0 %vm1676_vm0, %v1677_v1 }
  0xe6   : > { %1215 = vmatmul.mubr.f32.gmra.mrb[18].mxu0 %v367_v53 }
  0xe7   : > { %1217 = vmatprep.mubr.msk.f32.mxu0 %vm1676_vm0, %v1677_v1 }
  0xea   : > { %1218 = vmatmul.mubr.f32.gmra.mrb[20].mxu0 %v368_v54 }
  0xeb   : > { %1220 = vmatprep.mubr.msk.f32.mxu0 %vm1676_vm0, %v1677_v1 }
  0xee   : > { %1221 = vmatmul.mubr.f32.gmra.mrb[22].mxu0 %v369_v55 }
  0xef   : > { %1223 = vmatprep.mubr.msk.f32.mxu0 %vm1676_vm0, %v1677_v1 }
  0xf2   : > { %1224 = vmatmul.mubr.f32.gmra.mrb[24].mxu0 %v370_v56 }
  0xf3   : > { %837 = vmatprep.mubr.f32.mxu0 %v1677_v1 }
 0x195   : > { %v460_v40 = vpop.f32.mrb[0].mxu0 }
 0x196   : > { %v461_v41 = vadd.f32 %v1998_v39, %v460_v40  ;;  %v1189_v42 = vpop.f32.mrb[1].mxu0 }
 0x198   : > { %v524_v43 = vmul.f32 0.2, %v461_v41 }
 0x199   : > { %v465_v44 = vpop.f32.mrb[2].mxu0 }
 0x19a   : > { %v537_v45 = vmax.f32 %v461_v41, %v524_v43  ;;  %v466_v46 = vadd.f32 %v1998_v39, %v465_v44  ;;  %v1192_v47 = vpop.f32.mrb[3].mxu0  ;;  %v753_v43 = vld [vmem:[#allocation8 + $0xc0] sm:$0xff]  ;;  %v755_v44 = vld [vmem:[#allocation8 + $0xd0] sm:$0xff] }
 0x19b   : > { %v760_v47 = vld [vmem:[#allocation8 + $0xf8] sm:$0xff] }
 0x19c   : > { %v525_v48 = vmul.f32 0.2, %v466_v46  ;;  %1259 = vmatmul.mubr.f32.vlgmr.msra.gmra.mrb[0].mxu1 %v537_v45  ;;  %v1371_v45 = vpack.c.bf16 %v755_v44, %v753_v43 }
 0x19d   : > { %v470_v49 = vpop.f32.mrb[4].mxu0  ;;  %1261 = vmatprep.mubr.msk.f32.mxu1 %vm1676_vm0, %v1677_v1  ;;  %1385 = vmatpush1.bf16.msra.mxu1 %v1347_v8 }
 0x19e   : > { %v538_v50 = vmax.f32 %v466_v46, %v525_v48  ;;  %v471_v51 = vadd.f32 %v1998_v39, %v470_v49  ;;  %v1195_v52 = vpop.f32.mrb[5].mxu0  ;;  %1378 = vmatprep.subr.bf16.mxu1 %v1349_v9  ;;  %1372 = vmatpush1.bf16.msra.mxu0 %v1371_v45  ;;  %v758_v46 = vld [vmem:[#allocation8 + $0xe8] sm:$0xff]  ;;  %v757_v49 = vld [vmem:[#allocation8 + $0xe0] sm:$0xff] }
 0x19f   : > { %v1373_v48 = vpack.c.bf16 %v760_v47, %v758_v46 }
 0x1a0   : > { %v526_v53 = vmul.f32 0.2, %v471_v51  ;;  %1262 = vmatmul.mubr.f32.gmra.mrb[2].mxu1 %v538_v50 }
 0x1a1   : > { %v475_v54 = vpop.f32.mrb[6].mxu0  ;;  %1264 = vmatprep.mubr.msk.f32.mxu1 %vm1676_vm0, %v1677_v1  ;;  %1386 = vmatpush1.bf16.msra.mxu1 %v1351_v0 }
 0x1a2   : > { %v539_v55 = vmax.f32 %v471_v51, %v526_v53  ;;  %v476_v56 = vadd.f32 %v1998_v39, %v475_v54  ;;  %v1198_v57 = vpop.f32.mrb[7].mxu0  ;;  %1379 = vmatprep.subr.bf16.mxu1 %v1353_v14  ;;  %1374 = vmatprep.subr.bf16.mxu0 %v1373_v48  ;;  %v2044_v51 = vld [vmem:[%s2199_s4] ss:$0 sm:$0xff] }
 0x1a4   : > { %v527_v58 = vmul.f32 0.2, %v476_v56  ;;  %1265 = vmatmul.mubr.f32.gmra.mrb[4].mxu1 %v539_v55 }
 0x1a5   : > { %v480_v59 = vpop.f32.mrb[8].mxu0  ;;  %1267 = vmatprep.mubr.msk.f32.mxu1 %vm1676_vm0, %v1677_v1  ;;  %1387 = vmatpush1.bf16.msra.mxu1 %v1355_v19 }
 0x1a6   : > { %v540_v60 = vmax.f32 %v476_v56, %v527_v58  ;;  %v481_v61 = vadd.f32 %v1998_v39, %v480_v59  ;;  %v1201_v62 = vpop.f32.mrb[9].mxu0  ;;  %1380 = vmatprep.subr.bf16.mxu1 %v1357_v20 }
 0x1a8   : > { %v528_v63 = vmul.f32 0.2, %v481_v61  ;;  %1268 = vmatmul.mubr.f32.gmra.mrb[6].mxu1 %v540_v60 }
 0x1a9   : > { %v485_v2 = vpop.f32.mrb[10].mxu0  ;;  %1270 = vmatprep.mubr.msk.f32.mxu1 %vm1676_vm0, %v1677_v1  ;;  %1388 = vmatpush1.bf16.msra.mxu1 %v1359_v25 }
 0x1aa   : > { %v541_v3 = vmax.f32 %v481_v61, %v528_v63  ;;  %v486_v4 = vadd.f32 %v1998_v39, %v485_v2  ;;  %v1204_v5 = vpop.f32.mrb[11].mxu0  ;;  %1381 = vmatprep.subr.bf16.mxu1 %v1361_v26 }
 0x1ac   : > { %v529_v6 = vmul.f32 0.2, %v486_v4  ;;  %1271 = vmatmul.mubr.f32.gmra.mrb[8].mxu1 %v541_v3 }
 0x1ad   : > { %v490_v7 = vpop.f32.mrb[12].mxu0  ;;  %1273 = vmatprep.mubr.msk.f32.mxu1 %vm1676_vm0, %v1677_v1  ;;  %1389 = vmatpush1.bf16.msra.mxu1 %v1363_v31 }
 0x1ae   : > { %v542_v8 = vmax.f32 %v486_v4, %v529_v6  ;;  %v491_v9 = vadd.f32 %v1998_v39, %v490_v7  ;;  %v1207_v10 = vpop.f32.mrb[13].mxu0  ;;  %1382 = vmatprep.subr.bf16.mxu1 %v1986_v32 }
 0x1b0   : > { %v530_v11 = vmul.f32 0.2, %v491_v9  ;;  %1274 = vmatmul.mubr.f32.gmra.mrb[10].mxu1 %v542_v8 }
 0x1b1   : > { %v495_v12 = vpop.f32.mrb[14].mxu0  ;;  %1276 = vmatprep.mubr.msk.f32.mxu1 %vm1676_vm0, %v1677_v1  ;;  %1390 = vmatpush1.bf16.msra.mxu1 %v1988_v37 }
 0x1b2   : > { %v543_v13 = vmax.f32 %v491_v9, %v530_v11  ;;  %v496_v0 = vadd.f32 %v1998_v39, %v495_v12  ;;  %v1210_v14 = vpop.f32.mrb[15].mxu0  ;;  %1383 = vmatprep.subr.bf16.mxu1 %v1991_v38 }
 0x1b4   : > { %v531_v15 = vmul.f32 0.2, %v496_v0  ;;  %1277 = vmatmul.mubr.f32.gmra.mrb[12].mxu1 %v543_v13 }
 0x1b5   : > { %v500_v16 = vpop.f32.mrb[16].mxu0  ;;  %1279 = vmatprep.mubr.msk.f32.mxu1 %vm1676_vm0, %v1677_v1  ;;  %1391 = vmatpush1.bf16.msra.mxu1 %v1371_v45 }
 0x1b6   : > { %v544_v17 = vmax.f32 %v496_v0, %v531_v15  ;;  %v501_v18 = vadd.f32 %v1998_v39, %v500_v16  ;;  %v1213_v19 = vpop.f32.mrb[17].mxu0  ;;  %1384 = vmatprep.subr.bf16.mxu1 %v1373_v48 }
 0x1b8   : > { %v532_v20 = vmul.f32 0.2, %v501_v18  ;;  %1280 = vmatmul.mubr.f32.gmra.mrb[14].mxu1 %v544_v17 }
 0x1b9   : > { %v505_v21 = vpop.f32.mrb[18].mxu0  ;;  %1282 = vmatprep.mubr.msk.f32.mxu1 %vm1676_vm0, %v1677_v1 }
 0x1ba   : > { %v545_v22 = vmax.f32 %v501_v18, %v532_v20  ;;  %v506_v23 = vadd.f32 %v1998_v39, %v505_v21  ;;  %v1216_v24 = vpop.f32.mrb[19].mxu0 }
 0x1bc   : > { %v533_v25 = vmul.f32 0.2, %v506_v23  ;;  %1283 = vmatmul.mubr.f32.gmra.mrb[16].mxu1 %v545_v22 }
 0x1bd   : > { %v510_v26 = vpop.f32.mrb[20].mxu0  ;;  %1285 = vmatprep.mubr.msk.f32.mxu1 %vm1676_vm0, %v1677_v1 }
 0x1be   : > { %v546_v27 = vmax.f32 %v506_v23, %v533_v25  ;;  %v511_v28 = vadd.f32 %v1998_v39, %v510_v26  ;;  %v1219_v29 = vpop.f32.mrb[21].mxu0 }
 0x1c0   : > { %v534_v30 = vmul.f32 0.2, %v511_v28  ;;  %1286 = vmatmul.mubr.f32.gmra.mrb[18].mxu1 %v546_v27 }
 0x1c1   : > { %v515_v31 = vpop.f32.mrb[22].mxu0  ;;  %1288 = vmatprep.mubr.msk.f32.mxu1 %vm1676_vm0, %v1677_v1 }
 0x1c2   : > { %v547_v32 = vmax.f32 %v511_v28, %v534_v30  ;;  %v516_v33 = vadd.f32 %v1998_v39, %v515_v31  ;;  %v1222_v34 = vpop.f32.mrb[23].mxu0 }
 0x1c4   : > { %v535_v35 = vmul.f32 0.2, %v516_v33  ;;  %1289 = vmatmul.mubr.f32.gmra.mrb[20].mxu1 %v547_v32 }
 0x1c5   : > { %v520_v36 = vpop.f32.mrb[24].mxu0  ;;  %1291 = vmatprep.mubr.msk.f32.mxu1 %vm1676_vm0, %v1677_v1 }
 0x1c6   : > { %v548_v37 = vmax.f32 %v516_v33, %v535_v35  ;;  %v521_v38 = vadd.f32 %v1998_v39, %v520_v36  ;;  %v1225_v40 = vpop.f32.mrb[25].mxu0  ;;  %v759_v39 = vld [vmem:[#allocation8 + $0xf0] sm:$0xff] }
 0x1c7   : > { %v1375_v50 = vpack.c.bf16 %v759_v39, %v757_v49 }
 0x1c8   : > { %v536_v41 = vmul.f32 0.2, %v521_v38  ;;  %1292 = vmatmul.mubr.f32.gmra.mrb[22].mxu1 %v548_v37 }
 0x1c9   : > { %1294 = vmatprep.mubr.msk.f32.mxu1 %vm1676_vm0, %v1677_v1  ;;  %1376 = vmatpush1.bf16.msra.mxu0 %v1375_v50 }
 0x1ca   : > { %v549_v42 = vmax.f32 %v521_v38, %v536_v41  ;;  %1392 = vmatpush1.bf16.msra.mxu1 %v1375_v50 }
 0x1cc   : > { %1295 = vmatmul.mubr.f32.gmra.mrb[24].mxu1 %v549_v42 }
 0x1cd   : > { %879 = vmatprep.mubr.f32.mxu1 %v1677_v1 }
 0x26f   : > { %v639_v52 = vpop.f32.mrb[0].mxu1 }
 0x270   : > { %v640_v53 = vadd.f32 %v2044_v51, %v639_v52  ;;  %v1260_v54 = vpop.f32.mrb[1].mxu1 }
 0x272   : > { %v703_v55 = vmul.f32 0.2, %v640_v53 }
 0x273   : > { %v644_v56 = vpop.f32.mrb[2].mxu1 }
 0x274   : > { %v716_v57 = vmax.f32 %v640_v53, %v703_v55  ;;  %v645_v58 = vadd.f32 %v2044_v51, %v644_v56  ;;  %v1263_v59 = vpop.f32.mrb[3].mxu1  ;;  %v763_v55 = vlaneseq }
 0x276   : > { %v704_v60 = vmul.f32 0.2, %v645_v58  ;;  %838 = vmatmul.mubr.f32.vlgmr.msra.gmra.mrb[26].mxu0 %v716_v57  ;;  %v764_v56 = vshrl.u32 %v763_v55, 7 }
 0x277   : > { %v649_v61 = vpop.f32.mrb[4].mxu1  ;;  %843 = vmatprep.mubr.f32.mxu0 %v1677_v1 }
 0x278   : > { %v717_v62 = vmax.f32 %v645_v58, %v704_v60  ;;  %v650_v63 = vadd.f32 %v2044_v51, %v649_v61  ;;  %v1266_v2 = vpop.f32.mrb[5].mxu1  ;;  %v765_v57 = vsub.s32 0, %v764_v56  ;;  %v761_v58 = vld [vmem:[%s2201_s6] sm:$0x3]  ;;  %v769_v59 = vsub.s32 1, %v764_v56 }
 0x27a   : > { %v705_v3 = vmul.f32 0.2, %v650_v63  ;;  %844 = vmatmul.mubr.f32.gmra.mrb[28].mxu0 %v717_v62  ;;  %v2074_v60 = vrot.slane %v761_v58, %v765_v57  ;;  %v2076_v61 = vrot.slane %v761_v58, %v769_v59 }
 0x27b   : > { %v654_v4 = vpop.f32.mrb[6].mxu1  ;;  %849 = vmatprep.mubr.f32.mxu0 %v1677_v1 }
 0x27c   : > { %v718_v5 = vmax.f32 %v650_v63, %v705_v3  ;;  %v655_v6 = vadd.f32 %v2044_v51, %v654_v4  ;;  %v1269_v7 = vpop.f32.mrb[7].mxu1 }
 0x27e   : > { %v706_v8 = vmul.f32 0.2, %v655_v6  ;;  %850 = vmatmul.mubr.f32.gmra.mrb[30].mxu0 %v718_v5 }
 0x27f   : > { %v659_v9 = vpop.f32.mrb[8].mxu1  ;;  %855 = vmatprep.mubr.f32.mxu0 %v1677_v1 }
 0x280   : > { %v719_v10 = vmax.f32 %v655_v6, %v706_v8  ;;  %v660_v11 = vadd.f32 %v2044_v51, %v659_v9  ;;  %v1272_v12 = vpop.f32.mrb[9].mxu1 }
 0x282   : > { %v707_v13 = vmul.f32 0.2, %v660_v11  ;;  %856 = vmatmul.mubr.f32.gmra.mrb[32].mxu0 %v719_v10 }
 0x283   : > { %v664_v0 = vpop.f32.mrb[10].mxu1  ;;  %861 = vmatprep.mubr.f32.mxu0 %v1677_v1 }
 0x284   : > { %v720_v14 = vmax.f32 %v660_v11, %v707_v13  ;;  %v665_v15 = vadd.f32 %v2044_v51, %v664_v0  ;;  %v1275_v16 = vpop.f32.mrb[11].mxu1 }
 0x286   : > { %v708_v17 = vmul.f32 0.2, %v665_v15  ;;  %862 = vmatmul.mubr.f32.gmra.mrb[34].mxu0 %v720_v14 }
 0x287   : > { %v669_v18 = vpop.f32.mrb[12].mxu1  ;;  %867 = vmatprep.mubr.f32.mxu0 %v1677_v1 }
 0x288   : > { %v721_v19 = vmax.f32 %v665_v15, %v708_v17  ;;  %v670_v20 = vadd.f32 %v2044_v51, %v669_v18  ;;  %v1278_v21 = vpop.f32.mrb[13].mxu1 }
 0x28a   : > { %v709_v22 = vmul.f32 0.2, %v670_v20  ;;  %868 = vmatmul.mubr.f32.gmra.mrb[36].mxu0 %v721_v19 }
 0x28b   : > { %v674_v23 = vpop.f32.mrb[14].mxu1  ;;  %873 = vmatprep.mubr.f32.mxu0 %v1677_v1 }
 0x28c   : > { %v722_v24 = vmax.f32 %v670_v20, %v709_v22  ;;  %v675_v25 = vadd.f32 %v2044_v51, %v674_v23  ;;  %v1281_v26 = vpop.f32.mrb[15].mxu1 }
 0x28e   : > { %v710_v27 = vmul.f32 0.2, %v675_v25  ;;  %874 = vmatmul.mubr.f32.gmra.mrb[38].mxu0 %v722_v24 }
 0x28f   : > { %v679_v28 = vpop.f32.mrb[16].mxu1 }
 0x290   : > { %v723_v29 = vmax.f32 %v675_v25, %v710_v27  ;;  %v680_v30 = vadd.f32 %v2044_v51, %v679_v28  ;;  %v1284_v31 = vpop.f32.mrb[17].mxu1 }
 0x292   : > { %v711_v32 = vmul.f32 0.2, %v680_v30  ;;  %880 = vmatmul.mubr.f32.vlgmr.msra.gmra.mrb[26].mxu1 %v723_v29 }
 0x293   : > { %v684_v33 = vpop.f32.mrb[18].mxu1  ;;  %885 = vmatprep.mubr.f32.mxu1 %v1677_v1 }
 0x294   : > { %v724_v34 = vmax.f32 %v680_v30, %v711_v32  ;;  %v685_v35 = vadd.f32 %v2044_v51, %v684_v33  ;;  %v1287_v36 = vpop.f32.mrb[19].mxu1 }
 0x296   : > { %v712_v37 = vmul.f32 0.2, %v685_v35  ;;  %886 = vmatmul.mubr.f32.gmra.mrb[28].mxu1 %v724_v34 }
 0x297   : > { %v689_v38 = vpop.f32.mrb[20].mxu1  ;;  %891 = vmatprep.mubr.f32.mxu1 %v1677_v1 }
 0x298   : > { %v725_v40 = vmax.f32 %v685_v35, %v712_v37  ;;  %v690_v41 = vadd.f32 %v2044_v51, %v689_v38  ;;  %v1290_v42 = vpop.f32.mrb[21].mxu1 }
 0x29a   : > { %v713_v43 = vmul.f32 0.2, %v690_v41  ;;  %892 = vmatmul.mubr.f32.gmra.mrb[30].mxu1 %v725_v40 }
 0x29b   : > { %v694_v44 = vpop.f32.mrb[22].mxu1  ;;  %897 = vmatprep.mubr.f32.mxu1 %v1677_v1 }
 0x29c   : > { %v726_v45 = vmax.f32 %v690_v41, %v713_v43  ;;  %v695_v46 = vadd.f32 %v2044_v51, %v694_v44  ;;  %v1293_v47 = vpop.f32.mrb[23].mxu1 }
 0x29e   : > { %v714_v48 = vmul.f32 0.2, %v695_v46  ;;  %898 = vmatmul.mubr.f32.gmra.mrb[32].mxu1 %v726_v45 }
 0x29f   : > { %v699_v49 = vpop.f32.mrb[24].mxu1  ;;  %903 = vmatprep.mubr.f32.mxu1 %v1677_v1 }
 0x2a0   : > { %v727_v39 = vmax.f32 %v695_v46, %v714_v48  ;;  %v700_v50 = vadd.f32 %v2044_v51, %v699_v49  ;;  %v1296_v52 = vpop.f32.mrb[25].mxu1 }
 0x2a2   : > { %v715_v53 = vmul.f32 0.2, %v700_v50  ;;  %904 = vmatmul.mubr.f32.gmra.mrb[34].mxu1 %v727_v39 }
 0x2a3   : > { %909 = vmatprep.mubr.f32.mxu1 %v1677_v1 }
 0x2a4   : > { %v728_v54 = vmax.f32 %v700_v50, %v715_v53 }
 0x2a6   : > { %910 = vmatmul.mubr.f32.gmra.mrb[36].mxu1 %v728_v54 }
 0x349   : > { %v839_v51 = vpop.f32.mrb[26].mxu0 }
 0x34a   : > { %v840_v62 = vadd.f32 %v839_v51, %v2074_v60  ;;  %v841_v63 = vpop.f32.mrb[27].mxu0 }
 0x34b   : > { %v842_v1 = vadd.f32 %v841_v63, %v2076_v61 }
 0x34c   : > { %916 = vst [vmem:[%s2080_s9] sm:$0xff] %v840_v62 }
 0x34d   : > { %917 = vst [vmem:[%s2080_s9 + $0x8] sm:$0xff] %v842_v1  ;;  %v845_v2 = vpop.f32.mrb[28].mxu0 }
 0x34e   : > { %v846_v3 = vadd.f32 %v845_v2, %v2074_v60  ;;  %v847_v4 = vpop.f32.mrb[29].mxu0 }
 0x34f   : > { %v848_v5 = vadd.f32 %v847_v4, %v2076_v61 }
 0x350   : > { %918 = vst [vmem:[%s2080_s9 + $0x10] sm:$0xff] %v846_v3 }
 0x351   : > { %919 = vst [vmem:[%s2080_s9 + $0x18] sm:$0xff] %v848_v5  ;;  %v851_v6 = vpop.f32.mrb[30].mxu0 }
 0x352   : > { %v852_v7 = vadd.f32 %v851_v6, %v2074_v60  ;;  %v853_v8 = vpop.f32.mrb[31].mxu0 }
 0x353   : > { %v854_v9 = vadd.f32 %v853_v8, %v2076_v61 }
 0x354   : > { %920 = vst [vmem:[%s2080_s9 + $0x20] sm:$0xff] %v852_v7 }
 0x355   : > { %921 = vst [vmem:[%s2080_s9 + $0x28] sm:$0xff] %v854_v9  ;;  %v857_v10 = vpop.f32.mrb[32].mxu0 }
 0x356   : > { %v858_v11 = vadd.f32 %v857_v10, %v2074_v60  ;;  %v859_v12 = vpop.f32.mrb[33].mxu0 }
 0x357   : > { %v860_v13 = vadd.f32 %v859_v12, %v2076_v61 }
 0x358   : > { %922 = vst [vmem:[%s2080_s9 + $0x30] sm:$0xff] %v858_v11 }
 0x359   : > { %923 = vst [vmem:[%s2080_s9 + $0x38] sm:$0xff] %v860_v13  ;;  %v863_v0 = vpop.f32.mrb[34].mxu0 }
 0x35a   : > { %v864_v14 = vadd.f32 %v863_v0, %v2074_v60  ;;  %v865_v15 = vpop.f32.mrb[35].mxu0 }
 0x35b   : > { %v866_v16 = vadd.f32 %v865_v15, %v2076_v61 }
 0x35c   : > { %924 = vst [vmem:[%s2080_s9 + $0x40] sm:$0xff] %v864_v14 }
 0x35d   : > { %925 = vst [vmem:[%s2080_s9 + $0x48] sm:$0xff] %v866_v16  ;;  %v869_v17 = vpop.f32.mrb[36].mxu0 }
 0x35e   : > { %v870_v18 = vadd.f32 %v869_v17, %v2074_v60  ;;  %v871_v19 = vpop.f32.mrb[37].mxu0 }
 0x35f   : > { %v872_v20 = vadd.f32 %v871_v19, %v2076_v61 }
 0x360   : > { %926 = vst [vmem:[%s2080_s9 + $0x50] sm:$0xff] %v870_v18 }
 0x361   : > { %927 = vst [vmem:[%s2080_s9 + $0x58] sm:$0xff] %v872_v20  ;;  %v875_v21 = vpop.f32.mrb[38].mxu0 }
 0x362   : > { %v876_v22 = vadd.f32 %v875_v21, %v2074_v60  ;;  %v877_v23 = vpop.f32.mrb[39].mxu0 }
 0x363   : > { %v878_v24 = vadd.f32 %v877_v23, %v2076_v61 }
 0x364   : > { %928 = vst [vmem:[%s2080_s9 + $0x60] sm:$0xff] %v876_v22 }
 0x365   : > { %929 = vst [vmem:[%s2080_s9 + $0x68] sm:$0xff] %v878_v24  ;;  %v881_v25 = vpop.f32.mrb[26].mxu1 }
 0x366   : > { %v882_v26 = vadd.f32 %v881_v25, %v2074_v60  ;;  %v883_v27 = vpop.f32.mrb[27].mxu1 }
 0x367   : > { %v884_v28 = vadd.f32 %v883_v27, %v2076_v61 }
 0x368   : > { %930 = vst [vmem:[%s2080_s9 + $0x70] sm:$0xff] %v882_v26 }
 0x369   : > { %931 = vst [vmem:[%s2080_s9 + $0x78] sm:$0xff] %v884_v28  ;;  %v887_v29 = vpop.f32.mrb[28].mxu1 }
 0x36a   : > { %v888_v30 = vadd.f32 %v887_v29, %v2074_v60  ;;  %v889_v31 = vpop.f32.mrb[29].mxu1 }
 0x36b   : > { %v890_v32 = vadd.f32 %v889_v31, %v2076_v61 }
 0x36c   : > { %932 = vst [vmem:[%s2080_s9 + $0x80] sm:$0xff] %v888_v30 }
 0x36d   : > { %933 = vst [vmem:[%s2080_s9 + $0x88] sm:$0xff] %v890_v32  ;;  %v893_v33 = vpop.f32.mrb[30].mxu1 }
 0x36e   : > { %v894_v34 = vadd.f32 %v893_v33, %v2074_v60  ;;  %v895_v35 = vpop.f32.mrb[31].mxu1 }
 0x36f   : > { %v896_v36 = vadd.f32 %v895_v35, %v2076_v61 }
 0x370   : > { %934 = vst [vmem:[%s2080_s9 + $0x90] sm:$0xff] %v894_v34 }
 0x371   : > { %935 = vst [vmem:[%s2080_s9 + $0x98] sm:$0xff] %v896_v36  ;;  %v899_v37 = vpop.f32.mrb[32].mxu1 }
 0x372   : > { %v900_v38 = vadd.f32 %v899_v37, %v2074_v60  ;;  %v901_v40 = vpop.f32.mrb[33].mxu1 }
 0x373   : > { %v902_v41 = vadd.f32 %v901_v40, %v2076_v61 }
 0x374   : > { %936 = vst [vmem:[%s2080_s9 + $0xa0] sm:$0xff] %v900_v38 }
 0x375   : > { %937 = vst [vmem:[%s2080_s9 + $0xa8] sm:$0xff] %v902_v41  ;;  %v905_v42 = vpop.f32.mrb[34].mxu1 }
 0x376   : > { %v906_v43 = vadd.f32 %v905_v42, %v2074_v60  ;;  %v907_v44 = vpop.f32.mrb[35].mxu1 }
 0x377   : > { %v908_v45 = vadd.f32 %v907_v44, %v2076_v61  ;;  %949 = sbr.rel (!%p2230_p1) target bundleno = 922 (0x39a), region = 68 }
 0x378   : > { %938 = vst [vmem:[%s2080_s9 + $0xb0] sm:$0xff] %v906_v43 }
 0x379   : > { %939 = vst [vmem:[%s2080_s9 + $0xb8] sm:$0xff] %v908_v45  ;;  %v911_v46 = vpop.f32.mrb[36].mxu1 }
 0x37a   : > { %v912_v47 = vadd.f32 %v911_v46, %v2074_v60  ;;  %v913_v48 = vpop.f32.mrb[37].mxu1 }
 0x37b   : > { %v914_v49 = vadd.f32 %v913_v48, %v2076_v61 }
 0x37c   : > { %940 = vst [vmem:[%s2080_s9 + $0xc0] sm:$0xff] %v912_v47 }
 0x37d   : > { %941 = vst [vmem:[%s2080_s9 + $0xc8] sm:$0xff] %v914_v49 }
 0x37e   : > { %s2242_s8 = smov (!%p952_p3, %s951_s8), 13 }
 0x37f   : > { %s2136_s14 = sshll.u32 %s2242_s8, 8 }
 0x380   : > { %s957_s16 = ssub.s32 3328, %s2136_s14 }
 0x381   : > { %958 = vsyncadd %s943_s30, %s957_s16  ;;  %p1085_p6 = scmp.ne.s32.totalorder %s2136_s14, 0  ;;  %s1096_s13 = smul.u32 3328, %s1742_s28 }
 0x382   : > { %s964_s11 = sshll.u32 %s2080_s9, 4  ;;  %s1678_s12 = smov [#allocation10]   ;;  %s2149_s11 = int_to_ptr.vmem [resolvable:$true] %s964_s11 }
 0x383   : > { %s2147_s29 = scalar_lea.hbm %s2202_s7, %s1096_s13  ;;  %s1589_s24 = scalar_lea.vmem %s2149_s11, %s2136_s14 }
 0x384   : > { %p1590_p5 = scmp.ne.s32.totalorder %s2149_s11, %s1589_s24  ;;  %s1593_s15 = sshll.u32 %s1678_s12, 4  ;;  %s1594_s15 = int_to_ptr.vmem [resolvable:$false] %s1593_s15 }
 0x385   : > { %s1595_s28 = scalar_lea.vmem %s1594_s15, 6656  ;;  %p1596_p0 = scmp.lt.s32.totalorder %s2149_s11, %s1594_s15 }
 0x386   : > { %p1591_p11 = pnand %p1590_p5, %p1085_p6  ;;  %p1597_p12 = scmp.lt.s32.totalorder %s1595_s28, %s1589_s24 }
 0x388   : > { %p1592_p13 = pneg %p1591_p11  ;;  %p1598_p7 = por %p1597_p12, %p1596_p0 }
 0x38a   : > { %p1599_p2 = pnand %p1598_p7, %p1592_p13 }
 0x38c   : > { %1602 = shalt.err (!%p1599_p2)
}
 0x38d   : > { %s1603_s18 = scalar_lea.hbm %s2147_s29, %s2136_s14  ;;  %s1607_s20 = scalar_lea.hbm %s2202_s7, 6400 }
 0x38e   : > { %p1604_p8 = scmp.ne.s32.totalorder %s2147_s29, %s1603_s18  ;;  %p1608_p1 = scmp.lt.u32.totalorder %s2147_s29, %s2202_s7 }
 0x38f   : > { %p1609_p3 = scmp.lt.u32.totalorder %s1607_s20, %s1603_s18  ;;  %p1611_p11 = scmp.lt.u32.totalorder %s1603_s18, %s2147_s29 }
 0x390   : > { %p1605_p9 = pnand %p1604_p8, %p1085_p6 }
 0x391   : > { %p1610_p5 = por %p1609_p3, %p1608_p1 }
 0x392   : > { %p1606_p10 = pneg %p1605_p9 }
 0x393   : > { %p1612_p13 = por %p1611_p11, %p1610_p5 }
 0x395   : > { %p1613_p0 = pnand %p1612_p13, %p1606_p10 }
 0x397   : > { %1616 = shalt.err (!%p1613_p0)
}
 0x398   : > { %s1679_s10 = smov 256   ;;  %s1680_s8 = smov 16  }
 0x399   : > { %970 = dma.vmem_to_hbm [thread:$0]  (%p1085_p6), %s2149_s11, %s2136_s14, %s2147_s29, %s943_s30, %s1679_s10, %s1679_s10, %s1680_s8  }
 0x39a PF: > { %s2231_s16 = sld [smem:[#allocation15_spill]]  ;;  %s2232_s13 = sld [smem:[#allocation18_spill]] }
 0x3a0   : > { %s979_s21 = sand.u32 1, %s2231_s16   ;;  %p2233_p12 = scmp.ne.s32.totalorder %s2232_s13, 0 }
 0x3a1   : > { %s980_s22 = scalar_lea.sflag [#allocation4], %s979_s21 }
 0x3a2   : > { %p1421_p7 = pnand %p1071_p4, %p2233_p12 }
 0x3a4   : > { %1646 = dma.done.wait (!%p1421_p7), %s980_s22, 3328  }
 0x3a5   : > { %1648 = vsyncadd (!%p1421_p7), %s980_s22, 4294963968  ;;  %s2234_s27 = sld [smem:[#allocation16_spill]]  ;;  %s2235_s12 = sld [smem:[#allocation17_spill]] }
 0x3a6   : > { %s2236_s24 = smov %s1655_s25  ;;  %s2237_s25 = smov %s1659_s26 }
 0x3ab   : > { %p22_p2 = scmp.ge.s32.totalorder %s2234_s27, 4   ;;  %s2238_s26 = smov %s2235_s12 }
 0x3ad   :  { %24 = sbr.rel (!%p22_p2) target bundleno = 9 (0x9), region = 105 }
 0x3b4   :  { %985 = vsyncpa [#allocation3], 1 }
 0x3b5   :  { %987 = vsyncpa [#allocation3 + $0x1], 1 }
 0x3b6   :  { %988 = vsyncpa [#allocation6], 1 }
 0x3b7   :  { %989 = vsyncpa [#allocation9], 1 }
 0x3b8   :  { %990 = vsyncpa [#allocation4], 1 }
 0x3b9   :  { %992 = vsyncpa [#allocation4 + $0x1], 1 }

</bundles_post_ra>
